<compile_context>
chip_gen: v6e
topology: v6e:2x2x1
jax: 0.10.0
libtpu: 0.0.40
codegen_flags: <defaults>
</compile_context>

<pallas_src>
import functools

import jax
import jax.numpy as jnp
from jax.experimental import pallas as pl
from jax.experimental.pallas import tpu as pltpu

_TRAIN_PAD_SENTINEL = 1e9  # see header comment: large enough to underflow exp, finite in f32


def _round_up(x, m):
    return ((x + m - 1) // m) * m


def _kde_kernel(scal_ref, test_ref, train_ref, out_ref, acc_ref, *, use_bf16_exp: bool):
    """One (test-tile i, train-chunk k) grid step.

    scal_ref : SMEM (2,) f32   [ -1/(2*bw^2),  (1/sqrt(2*pi*bw^2)) / n_train ]
    test_ref : VMEM (1, 1, TN) test points, lane-dense
    train_ref: VMEM (TK, 1)    train chunk, sublane-dense
    out_ref  : VMEM (1, 1, TN) output block (resident across the reduction axis k)
    acc_ref  : VMEM (8, TN)    f32 partial sums, one row per sublane
    """
    k = pl.program_id(1)

    @pl.when(k == 0)
    def _init():
        acc_ref[...] = jnp.zeros_like(acc_ref)

    tk = train_ref.shape[0]
    neg_inv_two_var = scal_ref[0]

    # (1,1,TN) - (TK//8,8,1) broadcasts to (TK//8,8,TN): test broadcast across sublanes,
    # train broadcast across lanes -- no relayouts needed.
    t = train_ref[...].reshape(tk // 8, 8, 1)
    d = test_ref[...] - t
    arg = d * d * neg_inv_two_var                      # VALU only (scalar hoisted; no divide)
    if use_bf16_exp:
        e = jnp.exp(arg.astype(jnp.bfloat16)).astype(jnp.float32)   # bf16 EUP (v6e/v7x)
    else:
        e = jnp.exp(arg)                                            # f32 EUP (v5e and older)

    # Collapse only the leading sublane-group axis: plain per-vreg adds, no XLU per step.
    acc_ref[...] += jnp.sum(e, axis=0)

    @pl.when(k == pl.num_programs(1) - 1)
    def _finalize():
        total = jnp.sum(acc_ref[...], axis=0, keepdims=True)          # one XLU sublane reduce
        out_ref[...] = (total * scal_ref[1]).reshape(out_ref.shape)   # fold coef / n_train


def estimate_bandwidth(x, method="gauss-optimal"):
    """Matches the PyTorch estimate_bandwidth (torch.std(unbiased=True) -> ddof=1)."""
    n = x.shape[0]
    sample_std = jnp.std(x, ddof=1)
    m = method.lower()
    if m == "silverman":
        iqr = jnp.quantile(x, 0.75) - jnp.quantile(x, 0.25)
        return 0.9 * jnp.minimum(sample_std, iqr / 1.34) * n ** (-0.2)
    elif m == "gauss-optimal":
        return 1.06 * sample_std * n ** (-0.2)
    raise ValueError(f"Invalid method selected: {method}.")


def _use_bf16_exp_default():
    """bf16 exp only where the EUP is bf16-capable (v6e / v7x); never on v5e or older."""
    try:
        kind = jax.devices()[0].device_kind.lower().replace(" ", "")
    except Exception:
        return False
    return any(tag in kind for tag in ("v6", "v7", "6e", "7x"))


def kde_forward(test_xs, train_xs, bw, *, tile_test=2048, tile_train=1024,
                use_bf16_exp=None):
    """p(x) for each x in test_xs given train_xs (both 1-D, any length)."""
    if use_bf16_exp is None:
        use_bf16_exp = _use_bf16_exp_default()

    test_xs = jnp.asarray(test_xs, jnp.float32).reshape(-1)
    train_xs = jnp.asarray(train_xs, jnp.float32).reshape(-1)
    n_test = int(test_xs.shape[0])
    n_train = int(train_xs.shape[0])

    # Lane-dense test tile (multiple of 128).
    TN = min(_round_up(tile_test, 128), _round_up(n_test, 128))
    # Megacore (v7x 2-TC): keep >= 2 blocks on the parallel (test) axis whenever n_test
    # allows, so both TensorCores get work.  Harmless on single-TC chips (train HBM traffic
    # is tiny and the per-step exp count stays large).
    while TN > 128 and _round_up(n_test, TN) // TN < 2:
        TN = _round_up(TN // 2, 128)
    # Sublane-chunked train tile (multiple of 8), streamed over the "arbitrary" axis.
    TK = min(_round_up(tile_train, 8), _round_up(n_train, 8))

    n_test_pad = _round_up(n_test, TN)
    n_train_pad = _round_up(n_train, TK)

    # Pad: test with zeros (sliced off at the end); train with the finite sentinel so its
    # kernel contribution underflows to exactly 0.
    test_p = jnp.zeros((n_test_pad,), jnp.float32).at[:n_test].set(test_xs)
    train_p = jnp.full((n_train_pad,), _TRAIN_PAD_SENTINEL,
                       jnp.float32).at[:n_train].set(train_xs)

    test_3d = test_p.reshape(n_test_pad // TN, 1, TN)   # test on lanes
    train_2d = train_p.reshape(n_train_pad, 1)          # train on sublanes

    # Hoisted scalars -> kernel body is sub/mul/exp/add only.
    var = bw * bw
    neg_inv_two_var = -0.5 / var
    scale = 1.0 / (jnp.sqrt(2.0 * jnp.pi * var) * n_train)
    scalars = jnp.stack([jnp.asarray(neg_inv_two_var, jnp.float32),
                         jnp.asarray(scale, jnp.float32)])

    grid = (n_test_pad // TN, n_train_pad // TK)
    kernel = functools.partial(_kde_kernel, use_bf16_exp=use_bf16_exp)

    # Generous VMEM cap: ~5 full (TK, TN) f32 elementwise intermediates (no-reuse worst
    # case) + operand double-buffers; at default tiles this is ~44 MiB, under v7x's 64 MiB
    # physical and above v5e's 16 MiB scoped default.
    vmem_limit = int(min(max(5 * TK * TN * 4 + (4 << 20), 32 << 20), 56 << 20))

    out = pl.pallas_call(
        kernel,
        out_shape=jax.ShapeDtypeStruct((n_test_pad // TN, 1, TN), jnp.float32),
        grid=grid,
        in_specs=[
            pl.BlockSpec(memory_space=pltpu.SMEM),              # precomputed scalars
            pl.BlockSpec((1, 1, TN), lambda i, k: (i, 0, 0)),   # test tile (lane-dense)
            pl.BlockSpec((TK, 1), lambda i, k: (k, 0)),         # train chunk (sublanes)
        ],
        out_specs=pl.BlockSpec((1, 1, TN), lambda i, k: (i, 0, 0)),
        scratch_shapes=[pltpu.VMEM((8, TN), jnp.float32)],
        compiler_params=pltpu.CompilerParams(
            dimension_semantics=("parallel", "arbitrary"),
            vmem_limit_bytes=vmem_limit),
    )(scalars, test_3d, train_2d)

    return out.reshape(n_test_pad)[:n_test]


class KernelDensityEstimatorPallas:
    """Mirror of the PyTorch KernelDensityEstimator (gaussian kernel, Gauss-optimal bw)."""

    def __init__(self, train_Xs, kernel="gaussian", bw_select="Gauss-optimal",
                 use_bf16_exp=None):
        if kernel.lower() != "gaussian":
            raise NotImplementedError(f"'{kernel}' kernel not implemented.")
        self.train_xs = jnp.asarray(train_Xs, jnp.float32)
        if bw_select is not None:
            self.bw = estimate_bandwidth(self.train_xs, bw_select)
        else:
            self.bw = jnp.float32(0.05)
        self.use_bf16_exp = (_use_bf16_exp_default()
                             if use_bf16_exp is None else use_bf16_exp)
        # TODO(synk): sample() (host-side np.random.choice) and cdf() (Normal.cdf) are not
        # part of forward(); not implemented as Pallas kernels.

    def __call__(self, x):
        return kde_forward(jnp.asarray(x, jnp.float32), self.train_xs, self.bw,
                           use_bf16_exp=self.use_bf16_exp)


def _reference(test_xs, train_xs, bw):
    diffs = test_xs[:, None] - train_xs[None, :]
    var = bw * bw
    e = jnp.exp(-(diffs ** 2) / (2.0 * var))
    coef = 1.0 / jnp.sqrt(2.0 * jnp.pi * var)
    return (coef * e).mean(axis=1)


def _tols(use_bf16_exp):
    # bf16 exp trades ~1e-3..1e-2 relative accuracy for ~2x EUP throughput.
    return (5e-2, 1e-3) if use_bf16_exp else (3e-5, 1e-6)


if __name__ == "__main__":
    key = jax.random.PRNGKey(0)
    k_train, k_test, k_train2, k_test2 = jax.random.split(key, 4)

    # Case 1: small, non-multiple-of-8/128 shapes -> exercises the padding path.
    n_train, n_test = 200, 100
    train_xs = jax.random.normal(k_train, (n_train,), jnp.float32) * 0.5 + 1.0
    test_xs = jax.random.normal(k_test, (n_test,), jnp.float32) * 0.7 + 1.0

    kde = KernelDensityEstimatorPallas(train_xs)
    out = jax.block_until_ready(kde(test_xs))
    ref = _reference(test_xs, kde.train_xs, kde.bw)
    rtol, atol = _tols(kde.use_bf16_exp)
    assert out.shape == (n_test,)
    assert jnp.allclose(out, ref, rtol=rtol, atol=atol), (
        "case1 mismatch vs reference, max abs err = "
        f"{float(jnp.max(jnp.abs(out - ref)))}")

    # Case 2: exercises >1 block on the parallel (megacore) axis and >1 reduction step.
    n_train2, n_test2 = 2000, 300
    train_xs2 = jax.random.normal(k_train2, (n_train2,), jnp.float32) * 2.0
    test_xs2 = jax.random.normal(k_test2, (n_test2,), jnp.float32) * 2.0

    kde2 = KernelDensityEstimatorPallas(train_xs2)
    out2 = jax.block_until_ready(kde2(test_xs2))
    ref2 = _reference(test_xs2, kde2.train_xs, kde2.bw)
    rtol2, atol2 = _tols(kde2.use_bf16_exp)
    assert out2.shape == (n_test2,)
    assert jnp.allclose(out2, ref2, rtol=rtol2, atol=atol2), (
        "case2 mismatch vs reference, max abs err = "
        f"{float(jnp.max(jnp.abs(out2 - ref2)))}")

    print("KERNEL_OK")
</pallas_src>

<mosaic_0001>
module attributes {stable_mosaic.version = 11 : i64} {
  func.func @_kde_kernel(%arg0: i32, %arg1: i32, %arg2: memref<2xf32, #tpu.memory_space<smem>>, %arg3: memref<1x1x128xf32, #tpu.memory_space<vmem>>, %arg4: memref<200x1xf32, #tpu.memory_space<vmem>>, %arg5: memref<1x1x128xf32, #tpu.memory_space<vmem>>, %arg6: memref<8x128xf32, #tpu.memory_space<vmem>>) attributes {dimension_semantics = [#tpu.dimension_semantics<parallel>, #tpu.dimension_semantics<arbitrary>], iteration_bounds = array<i64: 1, 1>, scalar_prefetch = 0 : i64, scratch_operands = 1 : i64, tpu.core_type = #tpu.core_type<tc>, window_params = [{transform_indices = @transform_0, window_bounds = array<i64: 2>}, {transform_indices = @transform_1, window_bounds = array<i64: 1, 1, 128>}, {transform_indices = @transform_2, window_bounds = array<i64: 200, 1>}, {transform_indices = @transform_3, window_bounds = array<i64: 1, 1, 128>}]} {
    %c0_i32 = arith.constant 0 : i32
    %0 = arith.cmpi eq, %arg1, %c0_i32 : i32
    %1 = arith.extui %0 : i1 to i32
    %c0_i32_0 = arith.constant 0 : i32
    %2 = arith.cmpi ne, %1, %c0_i32_0 : i32
    scf.if %2 {
      %cst_12 = arith.constant 0.000000e+00 : f32
      %21 = vector.broadcast %cst_12 : f32 to vector<8x128xf32>
      %c0_13 = arith.constant 0 : index
      %c0_14 = arith.constant 0 : index
      %22 = vector.load %arg6[%c0_13, %c0_14] : memref<8x128xf32, #tpu.memory_space<vmem>>, vector<8x128xf32>
      tpu.vector_store %arg6[%c0_13, %c0_14], %21 {strides = array<i32>} : memref<8x128xf32, #tpu.memory_space<vmem>>, vector<8x128xf32>,
    } else {
    }
    %c0 = arith.constant 0 : index
    %3 = memref.load %arg2[%c0] : memref<2xf32, #tpu.memory_space<smem>>
    %c0_1 = arith.constant 0 : index
    %c0_2 = arith.constant 0 : index
    %4 = vector.load %arg4[%c0_1, %c0_2] : memref<200x1xf32, #tpu.memory_space<vmem>>, vector<200x1xf32>
    %5 = vector.shape_cast %4 : vector<200x1xf32> to vector<25x8x1xf32>
    %c0_3 = arith.constant 0 : index
    %c0_4 = arith.constant 0 : index
    %c0_5 = arith.constant 0 : index
    %6 = vector.load %arg3[%c0_3, %c0_4, %c0_5] : memref<1x1x128xf32, #tpu.memory_space<vmem>>, vector<1x1x128xf32>
    %7 = vector.broadcast %6 : vector<1x1x128xf32> to vector<25x8x128xf32>
    %8 = vector.broadcast %5 : vector<25x8x1xf32> to vector<25x8x128xf32>
    %9 = arith.subf %7, %8 : vector<25x8x128xf32>
    %10 = arith.mulf %9, %9 : vector<25x8x128xf32>
    %11 = vector.broadcast %3 : f32 to vector<25x8x128xf32>
    %12 = arith.mulf %10, %11 : vector<25x8x128xf32>
    %13 = math.exp %12 : vector<25x8x128xf32>
    %c0_6 = arith.constant 0 : index
    %c0_7 = arith.constant 0 : index
    %14 = vector.load %arg6[%c0_6, %c0_7] : memref<8x128xf32, #tpu.memory_space<vmem>>, vector<8x128xf32>
    %cst = arith.constant dense<0.000000e+00> : vector<8x128xf32>
    %15 = vector.multi_reduction <add>, %13, %cst [0] : vector<25x8x128xf32> to vector<8x128xf32>
    %16 = arith.addf %14, %15 : vector<8x128xf32>
    %c0_8 = arith.constant 0 : index
    %c0_9 = arith.constant 0 : index
    %17 = vector.load %arg6[%c0_8, %c0_9] : memref<8x128xf32, #tpu.memory_space<vmem>>, vector<8x128xf32>
    tpu.vector_store %arg6[%c0_8, %c0_9], %16 {strides = array<i32>} : memref<8x128xf32, #tpu.memory_space<vmem>>, vector<8x128xf32>,
    %c0_i32_10 = arith.constant 0 : i32
    %18 = arith.cmpi eq, %arg1, %c0_i32_10 : i32
    %19 = arith.extui %18 : i1 to i32
    %c0_i32_11 = arith.constant 0 : i32
    %20 = arith.cmpi ne, %19, %c0_i32_11 : i32
    scf.if %20 {
      %c0_12 = arith.constant 0 : index
      %c0_13 = arith.constant 0 : index
      %21 = vector.load %arg6[%c0_12, %c0_13] : memref<8x128xf32, #tpu.memory_space<vmem>>, vector<8x128xf32>
      %cst_14 = arith.constant dense<0.000000e+00> : vector<128xf32>
      %22 = vector.multi_reduction <add>, %21, %cst_14 [0] : vector<8x128xf32> to vector<128xf32>
      %23 = vector.shape_cast %22 : vector<128xf32> to vector<1x128xf32>
      %c1 = arith.constant 1 : index
      %24 = memref.load %arg2[%c1] : memref<2xf32, #tpu.memory_space<smem>>
      %25 = vector.broadcast %24 : f32 to vector<1x128xf32>
      %26 = arith.mulf %23, %25 : vector<1x128xf32>
      %27 = vector.shape_cast %26 : vector<1x128xf32> to vector<1x1x128xf32>
      %c0_15 = arith.constant 0 : index
      %c0_16 = arith.constant 0 : index
      %c0_17 = arith.constant 0 : index
      %28 = vector.load %arg5[%c0_15, %c0_16, %c0_17] : memref<1x1x128xf32, #tpu.memory_space<vmem>>, vector<1x1x128xf32>
      tpu.vector_store %arg5[%c0_15, %c0_16, %c0_17], %27 {strides = array<i32>} : memref<1x1x128xf32, #tpu.memory_space<vmem>>, vector<1x1x128xf32>,
    } else {
    }
    return
  }
  func.func @transform_0(%arg0: i32, %arg1: i32) -> i32 {
    %c0_i32 = arith.constant 0 : i32
    %c0_i32_0 = arith.constant 0 : i32
    return %c0_i32 : i32
  }
  func.func @transform_1(%arg0: i32, %arg1: i32) -> (i32, i32, i32) {
    %c0_i32 = arith.constant 0 : i32
    %c0_i32_0 = arith.constant 0 : i32
    %c0_i32_1 = arith.constant 0 : i32
    return %arg0, %c0_i32, %c0_i32_0 : i32, i32, i32
  }
  func.func @transform_2(%arg0: i32, %arg1: i32) -> (i32, i32) {
    %c0_i32 = arith.constant 0 : i32
    %c0_i32_0 = arith.constant 0 : i32
    return %arg1, %c0_i32 : i32, i32
  }
  func.func @transform_3(%arg0: i32, %arg1: i32) -> (i32, i32, i32) {
    %c0_i32 = arith.constant 0 : i32
    %c0_i32_0 = arith.constant 0 : i32
    %c0_i32_1 = arith.constant 0 : i32
    return %arg0, %c0_i32, %c0_i32_0 : i32, i32, i32
  }
}

</mosaic_0001>

<bundles_post_ra>
// kernel: tpu_custom_call.1
= control target key start
LH: loop header
LB: loop body
LE: loop exit
PB: predicated region body
PF: predicated region fallthrough
CT: control target
= control target key end

     0   :  { %8 = vsyncpa [#allocation5], 0  ;;  %s627_s0 = inlined_call_operand.vmem [shape: f32[2], index: 0, kind: input, shape index: {}]   ;;  %s628_s1 = inlined_call_operand.vmem [shape: f32[1,1,128], index: 1, kind: input, shape index: {}]   ;;  %s629_s2 = inlined_call_operand.vmem [shape: f32[200,1], index: 2, kind: input, shape index: {}]   ;;  %s630_s3 = inlined_call_operand.hbm [shape: f32[1,1,128], index: 3, kind: output, shape index: {}]  }
   0x1   :  { %9 = vsyncpa [#allocation4], 0  ;;  %s16_s14 = sshll.u32 %s627_s0, 4  ;;  %s17_s14 = int_to_ptr.vmem [resolvable:$true] %s16_s14 }
   0x2   :  { %s430_s15 = scalar_lea.vmem %s17_s14, 16  ;;  %p435_p1 = scmp.lt.s32.totalorder %s17_s14, %s17_s14 }
   0x3   :  { %p431_p0 = scmp.ne.s32.totalorder %s17_s14, %s430_s15  ;;  %p436_p2 = scmp.lt.s32.totalorder %s430_s15, %s430_s15 }
   0x5   :  { %p437_p3 = por %p436_p2, %p435_p1 }
   0x7   :  { %p438_p4 = pnand %p437_p3, %p431_p0 }
   0x9   :  { %441 = shalt.err (!%p438_p4)
}
   0xa   :  { %s466_s16 = smov [#allocation3]  }
   0xb   :  { %19 = dma.vmem_to_smem %s17_s14, 16, %s466_s16, [#allocation5]  }
   0xc   :  { %462 = dma.done.wait [#allocation5], 16  }
   0xd   :  { %463 = vsyncadd [#allocation5], 4294967280 }
   0xe   :  { %27 = sfence }
   0xf   :  { %v36_v0 = vld [vmem:[%s629_s2 + $0x10] sm:$0xff]  ;;  %v34_v1 = vld [vmem:[%s629_s2] sm:$0xff]  ;;  %v467_v2 = vmov 0   ;;  %v37_v3 = vld [vmem:[%s629_s2 + $0x18] sm:$0xff]  ;;  %s33_s11 = sld [smem:[#allocation3]] }
  0x10   :  { %379 = vset.pattern.permute.xlu1 %v467_v2  ;;  %378 = vset.pattern.permute.xlu0 %v467_v2  ;;  %v35_v4 = vld [vmem:[%s629_s2 + $0x8] sm:$0xff]  ;;  %v38_v6 = vld [vmem:[%s629_s2 + $0x20] sm:$0xff]  ;;  %v41_v7 = vld [vmem:[%s629_s2 + $0x38] sm:$0xff] }
  0x11   :  { %78 = vperm.xlu1 %379, %v36_v0   ;;  %68 = vperm.xlu0 %378, %v34_v1   ;;  %v39_v5 = vld [vmem:[%s629_s2 + $0x28] sm:$0xff]  ;;  %v40_v8 = vld [vmem:[%s629_s2 + $0x30] sm:$0xff]  ;;  %v42_v10 = vld [vmem:[%s629_s2 + $0x40] sm:$0xff] }
  0x12   :  { %v43_v9 = vld [vmem:[%s629_s2 + $0x48] sm:$0xff]  ;;  %v45_v11 = vld [vmem:[%s629_s2 + $0x58] sm:$0xff]  ;;  %v44_v12 = vld [vmem:[%s629_s2 + $0x50] sm:$0xff] }
  0x13   :  { %v47_v13 = vld [vmem:[%s629_s2 + $0x68] sm:$0xff]  ;;  %v46_v14 = vld [vmem:[%s629_s2 + $0x60] sm:$0xff]  ;;  %v49_v15 = vld [vmem:[%s629_s2 + $0x78] sm:$0xff] }
  0x14   :  { %v48_v16 = vld [vmem:[%s629_s2 + $0x70] sm:$0xff]  ;;  %v51_v17 = vld [vmem:[%s629_s2 + $0x88] sm:$0xff]  ;;  %v50_v18 = vld [vmem:[%s629_s2 + $0x80] sm:$0xff] }
  0x15   :  { %83 = vperm.xlu1 %379, %v37_v3   ;;  %73 = vperm.xlu0 %378, %v35_v4   ;;  %v53_v19 = vld [vmem:[%s629_s2 + $0x98] sm:$0xff]  ;;  %v52_v20 = vld [vmem:[%s629_s2 + $0x90] sm:$0xff]  ;;  %v55_v21 = vld [vmem:[%s629_s2 + $0xa8] sm:$0xff]  ;;  %v574_v31 = vstv %s33_s11 }
  0x16   :  { %v54_v22 = vld [vmem:[%s629_s2 + $0xa0] sm:$0xff]  ;;  %v57_v23 = vld [vmem:[%s629_s2 + $0xb8] sm:$0xff]  ;;  %v56_v24 = vld [vmem:[%s629_s2 + $0xb0] sm:$0xff] }
  0x17   :  { %v58_v25 = vld [vmem:[%s629_s2 + $0xc0] sm:$0xff]  ;;  %s468_s2 = smov [#allocation6]  }
  0x18   :  { %v570_v26 = vld [vmem:[%s628_s1] ss:$0 sm:$0xff]  ;;  %s374_s1 = sld [smem:[#allocation3 + $0x1]]  ;;  %s364_s14 = sshll.u32 %s468_s2, 4  ;;  %s365_s14 = int_to_ptr.vmem [resolvable:$true] %s364_s14 }
  0x19   :  { %93 = vperm.xlu1 %379, %v39_v5   ;;  %88 = vperm.xlu0 %378, %v38_v6   ;;  %s442_s15 = scalar_lea.vmem %s365_s14, 16  ;;  %s446_s16 = scalar_lea.vmem %s365_s14, 32 }
  0x1a   :  { %p443_p5 = scmp.ne.s32.totalorder %s365_s14, %s442_s15  ;;  %p447_p6 = scmp.lt.s32.totalorder %s365_s14, %s365_s14 }
  0x1b   :  { %p448_p7 = scmp.lt.s32.totalorder %s446_s16, %s442_s15 }
  0x1d   :  { %103 = vperm.xlu1 %379, %v41_v7   ;;  %98 = vperm.xlu0 %378, %v40_v8   ;;  %p449_p8 = por %p448_p7, %p447_p6 }
  0x1f   :  { %p450_p9 = pnand %p449_p8, %p443_p5 }
  0x21   :  { %113 = vperm.xlu1 %379, %v43_v9   ;;  %108 = vperm.xlu0 %378, %v42_v10  }
  0x25   :  { %123 = vperm.xlu1 %379, %v45_v11   ;;  %118 = vperm.xlu0 %378, %v44_v12  }
  0x29   :  { %133 = vperm.xlu1 %379, %v47_v13   ;;  %128 = vperm.xlu0 %378, %v46_v14  }
  0x2d   :  { %143 = vperm.xlu1 %379, %v49_v15   ;;  %138 = vperm.xlu0 %378, %v48_v16  }
  0x31   :  { %153 = vperm.xlu1 %379, %v51_v17   ;;  %148 = vperm.xlu0 %378, %v50_v18  }
  0x35   :  { %163 = vperm.xlu1 %379, %v53_v19   ;;  %158 = vperm.xlu0 %378, %v52_v20  }
  0x39   :  { %173 = vperm.xlu1 %379, %v55_v21   ;;  %168 = vperm.xlu0 %378, %v54_v22  }
  0x3d   :  { %183 = vperm.xlu1 %379, %v57_v23   ;;  %178 = vperm.xlu0 %378, %v56_v24  }
  0x41   :  { %188 = vperm.xlu0 %378, %v58_v25  }
  0x8c   :  { %v79_v27 = vpop.permute.xlu1 %78  ;;  %v69_v28 = vpop.permute.xlu0 %68 }
  0x8d   :  { %v193_v29 = vsub.f32 %v570_v26, %v79_v27  ;;  %v191_v30 = vsub.f32 %v570_v26, %v69_v28 }
  0x8f   :  { %v216_v32 = vmul.f32 %v191_v30, %v191_v30  ;;  %v218_v33 = vmul.f32 %v193_v29, %v193_v29 }
  0x90   :  { %v84_v34 = vpop.permute.xlu1 %83  ;;  %v74_v35 = vpop.permute.xlu0 %73 }
  0x91   :  { %v242_v36 = vmul.f32 %v574_v31, %v216_v32  ;;  %v194_v37 = vsub.f32 %v570_v26, %v84_v34  ;;  %v192_v38 = vsub.f32 %v570_v26, %v74_v35  ;;  %v244_v41 = vmul.f32 %v574_v31, %v218_v33 }
  0x93   :  { %v219_v39 = vmul.f32 %v194_v37, %v194_v37  ;;  %v217_v40 = vmul.f32 %v192_v38, %v192_v38  ;;  %v267_v44 = vmul.f32 1.442695, %v242_v36  ;;  %v271_v51 = vmul.f32 1.442695, %v244_v41 }
  0x94   :  { %v94_v42 = vpop.permute.xlu1 %93  ;;  %v89_v43 = vpop.permute.xlu0 %88 }
  0x95   :  { %v243_v45 = vmul.f32 %v574_v31, %v217_v40  ;;  %v196_v46 = vsub.f32 %v570_v26, %v94_v42  ;;  %v245_v47 = vmul.f32 %v574_v31, %v219_v39  ;;  %v195_v48 = vsub.f32 %v570_v26, %v89_v43 }
  0x96   :  { %380 = vpow2.f32 %v267_v44 }
  0x97   :  { %v269_v49 = vmul.f32 1.442695, %v243_v45  ;;  %v221_v50 = vmul.f32 %v196_v46, %v196_v46  ;;  %v220_v52 = vmul.f32 %v195_v48, %v195_v48  ;;  %v273_v57 = vmul.f32 1.442695, %v245_v47 }
  0x98   :  { %v104_v53 = vpop.permute.xlu1 %103  ;;  %v99_v54 = vpop.permute.xlu0 %98 }
  0x99   :  { %v198_v55 = vsub.f32 %v570_v26, %v104_v53  ;;  %v197_v56 = vsub.f32 %v570_v26, %v99_v54  ;;  %382 = vpow2.f32 %v269_v49  ;;  %v247_v58 = vmul.f32 %v574_v31, %v221_v50 }
  0x9a   :  { %v246_v59 = vmul.f32 %v574_v31, %v220_v52  ;;  %384 = vpow2.f32 %v271_v51 }
  0x9b   :  { %v223_v60 = vmul.f32 %v198_v55, %v198_v55  ;;  %v222_v61 = vmul.f32 %v197_v56, %v197_v56  ;;  %386 = vpow2.f32 %v273_v57  ;;  %v277_v3 = vmul.f32 1.442695, %v247_v58 }
  0x9c   :  { %v275_v62 = vmul.f32 1.442695, %v246_v59  ;;  %v114_v63 = vpop.permute.xlu1 %113  ;;  %v109_v0 = vpop.permute.xlu0 %108 }
  0x9d   :  { %v248_v1 = vmul.f32 %v574_v31, %v222_v61  ;;  %v200_v2 = vsub.f32 %v570_v26, %v114_v63  ;;  %v249_v4 = vmul.f32 %v574_v31, %v223_v60  ;;  %v199_v5 = vsub.f32 %v570_v26, %v109_v0 }
  0x9e   :  { %388 = vpow2.f32 %v275_v62 }
  0x9f   :  { %v225_v6 = vmul.f32 %v200_v2, %v200_v2  ;;  %v279_v7 = vmul.f32 1.442695, %v248_v1  ;;  %v224_v8 = vmul.f32 %v199_v5, %v199_v5  ;;  %390 = vpow2.f32 %v277_v3 }
  0xa0   :  { %v124_v9 = vpop.permute.xlu1 %123  ;;  %v119_v10 = vpop.permute.xlu0 %118  ;;  %v281_v13 = vmul.f32 1.442695, %v249_v4 }
  0xa1   :  { %v202_v11 = vsub.f32 %v570_v26, %v124_v9  ;;  %v201_v12 = vsub.f32 %v570_v26, %v119_v10  ;;  %v251_v14 = vmul.f32 %v574_v31, %v225_v6  ;;  %v250_v15 = vmul.f32 %v574_v31, %v224_v8 }
  0xa2   :  { %392 = vpow2.f32 %v279_v7 }
  0xa3   :  { %v227_v16 = vmul.f32 %v202_v11, %v202_v11  ;;  %v226_v17 = vmul.f32 %v201_v12, %v201_v12  ;;  %v283_v18 = vmul.f32 1.442695, %v250_v15  ;;  %v381_v24 = vpop.eup %380  ;;  %394 = vpow2.f32 %v281_v13 }
  0xa4   :  { %v134_v19 = vpop.permute.xlu1 %133  ;;  %v129_v20 = vpop.permute.xlu0 %128  ;;  %v285_v25 = vmul.f32 1.442695, %v251_v14 }
  0xa5   :  { %v253_v21 = vmul.f32 %v574_v31, %v227_v16  ;;  %v252_v22 = vmul.f32 %v574_v31, %v226_v17  ;;  %v204_v23 = vsub.f32 %v570_v26, %v134_v19  ;;  %v203_v27 = vsub.f32 %v570_v26, %v129_v20 }
  0xa6   :  { %v383_v28 = vpop.eup %382  ;;  %396 = vpow2.f32 %v283_v18 }
  0xa7   :  { %v229_v29 = vmul.f32 %v204_v23, %v204_v23  ;;  %v318_v30 = vadd.f32 %v383_v28, %v381_v24  ;;  %v287_v32 = vmul.f32 1.442695, %v252_v22  ;;  %v228_v33 = vmul.f32 %v203_v27, %v203_v27  ;;  %v385_v36 = vpop.eup %384 }
  0xa8   :  { %v144_v34 = vpop.permute.xlu1 %143  ;;  %v139_v35 = vpop.permute.xlu0 %138  ;;  %v289_v37 = vmul.f32 1.442695, %v253_v21  ;;  %398 = vpow2.f32 %v285_v25 }
  0xa9   :  { %v206_v38 = vsub.f32 %v570_v26, %v144_v34  ;;  %v205_v39 = vsub.f32 %v570_v26, %v139_v35  ;;  %v319_v40 = vadd.f32 %v385_v36, %v318_v30  ;;  %v255_v41 = vmul.f32 %v574_v31, %v229_v29  ;;  %v387_v43 = vpop.eup %386 }
  0xaa   :  { %v254_v42 = vmul.f32 %v574_v31, %v228_v33  ;;  %400 = vpow2.f32 %v287_v32 }
  0xab   :  { %v231_v44 = vmul.f32 %v206_v38, %v206_v38  ;;  %v230_v45 = vmul.f32 %v205_v39, %v205_v39  ;;  %v320_v46 = vadd.f32 %v387_v43, %v319_v40  ;;  %v389_v50 = vpop.eup %388  ;;  %402 = vpow2.f32 %v289_v37 }
  0xac   :  { %v291_v47 = vmul.f32 1.442695, %v254_v42  ;;  %v154_v48 = vpop.permute.xlu1 %153  ;;  %v149_v49 = vpop.permute.xlu0 %148  ;;  %v293_v54 = vmul.f32 1.442695, %v255_v41 }
  0xad   :  { %v256_v51 = vmul.f32 %v574_v31, %v230_v45  ;;  %v208_v52 = vsub.f32 %v570_v26, %v154_v48  ;;  %v321_v53 = vadd.f32 %v389_v50, %v320_v46  ;;  %v257_v55 = vmul.f32 %v574_v31, %v231_v44  ;;  %v391_v57 = vpop.eup %390 }
  0xae   :  { %v207_v56 = vsub.f32 %v570_v26, %v149_v49  ;;  %404 = vpow2.f32 %v291_v47 }
  0xaf   :  { %v233_v58 = vmul.f32 %v208_v52, %v208_v52  ;;  %v322_v59 = vadd.f32 %v391_v57, %v321_v53  ;;  %v295_v60 = vmul.f32 1.442695, %v256_v51  ;;  %v393_v0 = vpop.eup %392  ;;  %406 = vpow2.f32 %v293_v54 }
  0xb0   :  { %v232_v61 = vmul.f32 %v207_v56, %v207_v56  ;;  %v164_v62 = vpop.permute.xlu1 %163  ;;  %v159_v63 = vpop.permute.xlu0 %158  ;;  %v297_v5 = vmul.f32 1.442695, %v257_v55 }
  0xb1   :  { %v259_v1 = vmul.f32 %v574_v31, %v233_v58  ;;  %v210_v2 = vsub.f32 %v570_v26, %v164_v62  ;;  %v209_v3 = vsub.f32 %v570_v26, %v159_v63  ;;  %v323_v4 = vadd.f32 %v393_v0, %v322_v59  ;;  %v395_v7 = vpop.eup %394 }
  0xb2   :  { %v258_v6 = vmul.f32 %v574_v31, %v232_v61  ;;  %408 = vpow2.f32 %v295_v60 }
  0xb3   :  { %v235_v8 = vmul.f32 %v210_v2, %v210_v2  ;;  %v234_v9 = vmul.f32 %v209_v3, %v209_v3  ;;  %v324_v10 = vadd.f32 %v395_v7, %v323_v4  ;;  %v397_v14 = vpop.eup %396  ;;  %v301_v15 = vmul.f32 1.442695, %v259_v1 }
  0xb4   :  { %v299_v11 = vmul.f32 1.442695, %v258_v6  ;;  %v174_v12 = vpop.permute.xlu1 %173  ;;  %v169_v13 = vpop.permute.xlu0 %168  ;;  %410 = vpow2.f32 %v297_v5 }
  0xb5   :  { %v260_v16 = vmul.f32 %v574_v31, %v234_v9  ;;  %v212_v17 = vsub.f32 %v570_v26, %v174_v12  ;;  %v325_v18 = vadd.f32 %v397_v14, %v324_v10  ;;  %v261_v19 = vmul.f32 %v574_v31, %v235_v8  ;;  %v399_v21 = vpop.eup %398 }
  0xb6   :  { %v211_v20 = vsub.f32 %v570_v26, %v169_v13  ;;  %412 = vpow2.f32 %v299_v11 }
  0xb7   :  { %v237_v22 = vmul.f32 %v212_v17, %v212_v17  ;;  %v326_v23 = vadd.f32 %v399_v21, %v325_v18  ;;  %v303_v24 = vmul.f32 1.442695, %v260_v16  ;;  %v401_v29 = vpop.eup %400  ;;  %414 = vpow2.f32 %v301_v15 }
  0xb8   :  { %v236_v25 = vmul.f32 %v211_v20, %v211_v20  ;;  %v184_v27 = vpop.permute.xlu1 %183  ;;  %v179_v28 = vpop.permute.xlu0 %178  ;;  %v305_v35 = vmul.f32 1.442695, %v261_v19  ;;  %v355_v17 = vstv %s374_s1 }
  0xb9   :  { %v214_v30 = vsub.f32 %v570_v26, %v184_v27  ;;  %v213_v32 = vsub.f32 %v570_v26, %v179_v28  ;;  %v403_v33 = vpop.eup %402  ;;  %v327_v34 = vadd.f32 %v401_v29, %v326_v23  ;;  %v263_v36 = vmul.f32 %v574_v31, %v237_v22 }
  0xba   :  { %v262_v37 = vmul.f32 %v574_v31, %v236_v25  ;;  %416 = vpow2.f32 %v303_v24 }
  0xbb   :  { %v239_v38 = vmul.f32 %v214_v30, %v214_v30  ;;  %v238_v39 = vmul.f32 %v213_v32, %v213_v32  ;;  %v328_v40 = vadd.f32 %v403_v33, %v327_v34  ;;  %v405_v43 = vpop.eup %404  ;;  %418 = vpow2.f32 %v305_v35 }
  0xbc   :  { %v307_v41 = vmul.f32 1.442695, %v262_v37  ;;  %v189_v42 = vpop.permute.xlu0 %188  ;;  %v309_v47 = vmul.f32 1.442695, %v263_v36  ;;  %v407_v49 = vpop.eup %406 }
  0xbd   :  { %v264_v44 = vmul.f32 %v574_v31, %v238_v39  ;;  %v215_v45 = vsub.f32 %v570_v26, %v189_v42  ;;  %v329_v46 = vadd.f32 %v405_v43, %v328_v40  ;;  %v265_v48 = vmul.f32 %v574_v31, %v239_v38 }
  0xbe   :  { %420 = vpow2.f32 %v307_v41 }
  0xbf   :  { %v240_v50 = vmul.f32 %v215_v45, %v215_v45  ;;  %v330_v51 = vadd.f32 %v407_v49, %v329_v46  ;;  %v311_v52 = vmul.f32 1.442695, %v264_v44  ;;  %v409_v53 = vpop.eup %408  ;;  %422 = vpow2.f32 %v309_v47 }
  0xc0   :  { %v313_v56 = vmul.f32 1.442695, %v265_v48 }
  0xc1   :  { %v266_v54 = vmul.f32 %v574_v31, %v240_v50  ;;  %v331_v55 = vadd.f32 %v409_v53, %v330_v51  ;;  %v411_v57 = vpop.eup %410  ;;  %424 = vpow2.f32 %v311_v52 }
  0xc2   :  { %426 = vpow2.f32 %v313_v56 }
  0xc3   :  { %v332_v58 = vadd.f32 %v411_v57, %v331_v55  ;;  %v315_v26 = vmul.f32 1.442695, %v266_v54  ;;  %v413_v59 = vpop.eup %412 }
  0xc4   :  { %v415_v60 = vpop.eup %414 }
  0xc5   :  { %v333_v61 = vadd.f32 %v413_v59, %v332_v58  ;;  %428 = vpow2.f32 %v315_v26 }
  0xc7   :  { %v334_v62 = vadd.f32 %v415_v60, %v333_v61  ;;  %v417_v63 = vpop.eup %416 }
  0xc8   :  { %v419_v1 = vpop.eup %418 }
  0xc9   :  { %v335_v0 = vadd.f32 %v417_v63, %v334_v62 }
  0xcb   :  { %v336_v2 = vadd.f32 %v419_v1, %v335_v0  ;;  %v421_v3 = vpop.eup %420 }
  0xcc   :  { %v423_v31 = vpop.eup %422 }
  0xcd   :  { %v337_v4 = vadd.f32 %v421_v3, %v336_v2 }
  0xce   :  { %v425_v6 = vpop.eup %424 }
  0xcf   :  { %v338_v5 = vadd.f32 %v423_v31, %v337_v4  ;;  %v427_v8 = vpop.eup %426 }
  0xd1   :  { %v339_v7 = vadd.f32 %v425_v6, %v338_v5 }
  0xd2   :  { %v429_v10 = vpop.eup %428 }
  0xd3   :  { %v340_v9 = vadd.f32 %v427_v8, %v339_v7 }
  0xd5   :  { %v341_v11 = vadd.f32 %v429_v10, %v340_v9 }
  0xd7   :  { %v348_v12 = vrot.slane %v341_v11, 4 }
  0xd9   :  { %v349_v13 = vadd.f32 %v348_v12, %v341_v11 }
  0xdb   :  { %v350_v14 = vrot.slane %v349_v13, 2 }
  0xdd   :  { %v351_v15 = vadd.f32 %v350_v14, %v349_v13 }
  0xdf   :  { %v352_v16 = vrot.slane %v351_v15, 1 }
  0xe1   :  { %v353_v18 = vadd.f32 %v352_v16, %v351_v15 }
  0xe3   :  { %v356_v19 = vmul.f32 %v355_v17, %v353_v18 }
  0xe5   :  { %357 = vst [vmem:[#allocation6] sm:$0x1] %v356_v19 }
  0xe6   :  { %453 = shalt.err (!%p450_p9)
}
  0xe7   :  { %367 = dma.vmem_to_hbm [thread:$0]  %s365_s14, 16, %s630_s3, [#allocation4]  }
  0xe8   :  { %464 = dma.done.wait [#allocation4], 16  }
  0xe9   :  { %465 = vsyncadd [#allocation4], 4294967280 }
  0xea   :  { %371 = vsyncpa [#allocation4], 1 }
  0xeb   :  { %372 = vsyncpa [#allocation5], 1 }

</bundles_post_ra>
